<compile_context>
chip_gen: v7x
topology: tpu7x:2x2x1
jax: 0.10.0
libtpu: 0.0.40
codegen_flags: <defaults>
</compile_context>

<pallas_src>
import functools

import jax
import jax.numpy as jnp
from jax.experimental import pallas as pl
from jax.experimental.pallas import tpu as pltpu

_EPS = 1e-8            # F.cosine_similarity default eps
_TRIPLET_MARGIN = 1.0  # nn.TripletMarginWithDistanceLoss default margin


def _pick_tile_b(B, D, itemsize, target_bytes=2 << 20, budget_bytes=24 << 20):
    """Batch tile: multiple of 8, ~target_bytes per input block, within VMEM budget."""
    per_row = max(D * itemsize, 1)
    tb_target = (target_bytes // per_row) // 8 * 8
    tb_budget = (budget_bytes // (6 * per_row)) // 8 * 8   # 3 inputs x 2 pipeline bufs
    b_up = -(-B // 8) * 8
    tb = min(max(min(tb_target, tb_budget), 8), b_up)
    return max(tb, 8)


def _custom_loss_kernel(a_ref, p_ref, n_ref, pred_ref, lab_ref,
                        trip_ref, bce_ref, acc_t, acc_b, *, tile_b, batch):
    c = pl.program_id(0)               # core-split axis ("parallel")
    i = pl.program_id(1)               # batch-tile axis ("arbitrary" reduction)
    n_inner = pl.num_programs(1)

    @pl.when(i == 0)
    def _init():
        acc_t[...] = jnp.zeros_like(acc_t)
        acc_b[...] = jnp.zeros_like(acc_b)

    # Logical tile index (may point past the last real tile; such rows are masked).
    t = c * n_inner + i
    rows = t * tile_b + jax.lax.broadcasted_iota(jnp.int32, (tile_b, 1), 0)
    valid = rows < batch                                     # (TB, 1)

    a = a_ref[...].astype(jnp.float32)
    p = p_ref[...].astype(jnp.float32)
    n = n_ref[...].astype(jnp.float32)

    # ||a||^2 computed once, shared between both cosines.
    saa = jnp.sum(a * a, axis=1, keepdims=True)
    spp = jnp.sum(p * p, axis=1, keepdims=True)
    snn = jnp.sum(n * n, axis=1, keepdims=True)
    dap = jnp.sum(a * p, axis=1, keepdims=True)
    dan = jnp.sum(a * n, axis=1, keepdims=True)

    # cos(x,y) = dot / max(||x||*||y||, eps) == dot * rsqrt(max(||x||^2*||y||^2, eps^2))
    cos_ap = dap * jax.lax.rsqrt(jnp.maximum(saa * spp, _EPS * _EPS))
    cos_an = dan * jax.lax.rsqrt(jnp.maximum(saa * snn, _EPS * _EPS))

    # distance = 1 - cos  =>  d_ap - d_an == cos_an - cos_ap; masked per-row hinge sum.
    hinge = jnp.maximum(cos_an - cos_ap + _TRIPLET_MARGIN, 0.0)     # (TB, 1)
    hinge = jnp.where(valid, hinge, 0.0)
    acc_t[...] += jnp.sum(hinge, axis=0, keepdims=True)             # (1, 1)

    # binary_cross_entropy_with_logits partial sum for this batch tile.
    x = pred_ref[...]                                               # (TB, Lc) f32
    y = lab_ref[...]
    bce = jnp.maximum(x, 0.0) - x * y + jnp.log1p(jnp.exp(-jnp.abs(x)))
    bce = jnp.where(valid, bce, 0.0)
    acc_b[...] += jnp.sum(jnp.sum(bce, axis=1, keepdims=True), axis=0, keepdims=True)

    @pl.when(i == n_inner - 1)
    def _finalize():
        trip_ref[...] = acc_t[...]
        bce_ref[...] = acc_b[...]


def custom_loss(anchor, positive, negative, label, pred_label, *,
                tile_b=None, target_block_bytes=2 << 20):
    """Returns (triplet_loss, label_loss, total_loss) as scalar f32 arrays."""
    assert anchor.shape == positive.shape == negative.shape
    B, D = anchor.shape
    itemsize = jnp.dtype(anchor.dtype).itemsize

    # Labels as [B, Lc] f32 (matches the module's pred_label.float()/label.float()).
    pred2 = jnp.reshape(pred_label, (B, -1)).astype(jnp.float32)
    lab2 = jnp.reshape(label, (B, -1)).astype(jnp.float32)
    assert pred2.shape == lab2.shape
    Lc = pred2.shape[1]
    n_label = B * Lc

    TB = _pick_tile_b(B, D, itemsize, target_block_bytes) if tile_b is None else tile_b
    assert TB % 8 == 0, TB
    total_tiles = -(-B // TB)                  # cdiv
    num_cores = 2 if total_tiles >= 2 else 1   # v7x megacore split; serial elsewhere
    tiles_per_core = -(-total_tiles // num_cores)
    max_tile = total_tiles - 1

    def tile_idx(c, i):
        # Clamp so tail tiles never DMA out of range; masked in-kernel instead.
        return (jnp.minimum(c * tiles_per_core + i, max_tile), 0)

    vec_spec = pl.BlockSpec((TB, D), tile_idx)
    lab_spec = pl.BlockSpec((TB, Lc), tile_idx)
    part_shape = jax.ShapeDtypeStruct((num_cores, 1), jnp.float32)
    part_spec = pl.BlockSpec((1, 1), lambda c, i: (c, 0))

    vmem_need = 3 * 2 * TB * D * itemsize + 2 * 2 * TB * Lc * 4 + (1 << 16)
    vmem_limit = int(min(max(vmem_need + (8 << 20), 32 << 20), 56 << 20))

    kernel = functools.partial(_custom_loss_kernel, tile_b=TB, batch=B)

    trip_part, bce_part = pl.pallas_call(
        kernel,
        out_shape=(part_shape, part_shape),
        grid=(num_cores, tiles_per_core),
        in_specs=[vec_spec, vec_spec, vec_spec, lab_spec, lab_spec],
        out_specs=(part_spec, part_spec),
        scratch_shapes=[pltpu.VMEM((1, 1), jnp.float32),
                        pltpu.VMEM((1, 1), jnp.float32)],
        compiler_params=pltpu.CompilerParams(
            dimension_semantics=("parallel", "arbitrary"),
            vmem_limit_bytes=vmem_limit),
    )(anchor, positive, negative, pred2, lab2)

    # Tiny per-core partial combine (<= 2 elements each) in the wrapper.
    trip = jnp.sum(trip_part) / B
    bce = jnp.sum(bce_part) / n_label
    return trip, bce, trip + bce


def _reference(anchor, positive, negative, label, pred_label):
    a = anchor.astype(jnp.float32)
    p = positive.astype(jnp.float32)
    n = negative.astype(jnp.float32)

    def cos(x, y):
        dot = jnp.sum(x * y, axis=1)
        nx = jnp.sqrt(jnp.sum(x * x, axis=1))
        ny = jnp.sqrt(jnp.sum(y * y, axis=1))
        return dot / jnp.maximum(nx * ny, _EPS)

    d_ap = 1.0 - cos(a, p)
    d_an = 1.0 - cos(a, n)
    trip = jnp.mean(jnp.maximum(d_ap - d_an + _TRIPLET_MARGIN, 0.0))
    x = pred_label.astype(jnp.float32)
    y = label.astype(jnp.float32)
    bce = jnp.mean(jnp.maximum(x, 0.0) - x * y + jnp.log1p(jnp.exp(-jnp.abs(x))))
    return trip, bce, trip + bce


if __name__ == "__main__":
    key = jax.random.PRNGKey(0)
    k_a, k_p, k_n, k_pred, k_lab = jax.random.split(key, 5)

    # Small shape consistent with the module (single-tile path).
    B, D = 8, 32
    anchor = jax.random.normal(k_a, (B, D), dtype=jnp.float32)
    positive = jax.random.normal(k_p, (B, D), dtype=jnp.float32)
    negative = jax.random.normal(k_n, (B, D), dtype=jnp.float32)
    pred_label = jax.random.normal(k_pred, (B, 1), dtype=jnp.float32)
    label = (jax.random.uniform(k_lab, (B, 1)) > 0.5).astype(jnp.float32)

    trip, bce, tot = custom_loss(anchor, positive, negative, label, pred_label)
    jax.block_until_ready((trip, bce, tot))
    r_trip, r_bce, r_tot = _reference(anchor, positive, negative, label, pred_label)
    assert jnp.allclose(trip, r_trip, atol=1e-4), (trip, r_trip)
    assert jnp.allclose(bce, r_bce, atol=1e-4), (bce, r_bce)
    assert jnp.allclose(tot, r_tot, atol=1e-4), (tot, r_tot)

    # Ragged batch + multi-tile + 2-way core-split path (grid (2, 3), masked tail).
    B2, D2 = 37, 128
    k2 = jax.random.split(jax.random.PRNGKey(1), 5)
    anchor2 = jax.random.normal(k2[0], (B2, D2), dtype=jnp.float32)
    positive2 = jax.random.normal(k2[1], (B2, D2), dtype=jnp.float32)
    negative2 = jax.random.normal(k2[2], (B2, D2), dtype=jnp.float32)
    pred_label2 = jax.random.normal(k2[3], (B2, 1), dtype=jnp.float32)
    label2 = (jax.random.uniform(k2[4], (B2, 1)) > 0.5).astype(jnp.float32)

    trip2, bce2, tot2 = custom_loss(anchor2, positive2, negative2, label2,
                                    pred_label2, tile_b=8)
    jax.block_until_ready((trip2, bce2, tot2))
    r2 = _reference(anchor2, positive2, negative2, label2, pred_label2)
    assert jnp.allclose(trip2, r2[0], atol=1e-4), (trip2, r2[0])
    assert jnp.allclose(bce2, r2[1], atol=1e-4), (bce2, r2[1])
    assert jnp.allclose(tot2, r2[2], atol=1e-4), (tot2, r2[2])

    print("KERNEL_OK")
</pallas_src>

<mosaic_0001>
module attributes {stable_mosaic.version = 11 : i64} {
  func.func @_custom_loss_kernel(%arg0: i32, %arg1: i32, %arg2: memref<8x32xf32, #tpu.memory_space<vmem>>, %arg3: memref<8x32xf32, #tpu.memory_space<vmem>>, %arg4: memref<8x32xf32, #tpu.memory_space<vmem>>, %arg5: memref<8x1xf32, #tpu.memory_space<vmem>>, %arg6: memref<8x1xf32, #tpu.memory_space<vmem>>, %arg7: memref<1x1xf32, #tpu.memory_space<vmem>>, %arg8: memref<1x1xf32, #tpu.memory_space<vmem>>, %arg9: memref<1x1xf32, #tpu.memory_space<vmem>>, %arg10: memref<1x1xf32, #tpu.memory_space<vmem>>) attributes {dimension_semantics = [#tpu.dimension_semantics<parallel>, #tpu.dimension_semantics<arbitrary>], iteration_bounds = array<i64: 1, 1>, scalar_prefetch = 0 : i64, scratch_operands = 2 : i64, tpu.core_type = #tpu.core_type<tc>, window_params = [{transform_indices = @transform_0, window_bounds = array<i64: 8, 32>}, {transform_indices = @transform_1, window_bounds = array<i64: 8, 32>}, {transform_indices = @transform_2, window_bounds = array<i64: 8, 32>}, {transform_indices = @transform_3, window_bounds = array<i64: 8, 1>}, {transform_indices = @transform_4, window_bounds = array<i64: 8, 1>}, {transform_indices = @transform_5, window_bounds = array<i64: 1, 1>}, {transform_indices = @transform_6, window_bounds = array<i64: 1, 1>}]} {
    %c0_i32 = arith.constant 0 : i32
    %0 = arith.cmpi eq, %arg1, %c0_i32 : i32
    %1 = arith.extui %0 : i1 to i32
    %c0_i32_0 = arith.constant 0 : i32
    %2 = arith.cmpi ne, %1, %c0_i32_0 : i32
    scf.if %2 {
      %cst_36 = arith.constant 0.000000e+00 : f32
      %75 = vector.broadcast %cst_36 : f32 to vector<1x1xf32>
      %c0_37 = arith.constant 0 : index
      %c0_38 = arith.constant 0 : index
      %76 = vector.load %arg9[%c0_37, %c0_38] : memref<1x1xf32, #tpu.memory_space<vmem>>, vector<1x1xf32>
      tpu.vector_store %arg9[%c0_37, %c0_38], %75 {strides = array<i32>} : memref<1x1xf32, #tpu.memory_space<vmem>>, vector<1x1xf32>,
      %cst_39 = arith.constant 0.000000e+00 : f32
      %77 = vector.broadcast %cst_39 : f32 to vector<1x1xf32>
      %c0_40 = arith.constant 0 : index
      %c0_41 = arith.constant 0 : index
      %78 = vector.load %arg10[%c0_40, %c0_41] : memref<1x1xf32, #tpu.memory_space<vmem>>, vector<1x1xf32>
      tpu.vector_store %arg10[%c0_40, %c0_41], %77 {strides = array<i32>} : memref<1x1xf32, #tpu.memory_space<vmem>>, vector<1x1xf32>,
    } else {
    }
    %c1_i32 = arith.constant 1 : i32
    %3 = arith.muli %arg0, %c1_i32 : i32
    %4 = arith.addi %3, %arg1 : i32
    %c8_i32 = arith.constant 8 : i32
    %5 = arith.muli %4, %c8_i32 : i32
    %6 = tpu.iota {dimensions = array<i32: 0>} : vector<8x1xi32>
    %7 = vector.broadcast %5 : i32 to vector<8x1xi32>
    %8 = arith.addi %7, %6 : vector<8x1xi32>
    %c8_i32_1 = arith.constant 8 : i32
    %9 = vector.broadcast %c8_i32_1 : i32 to vector<8x1xi32>
    %10 = arith.cmpi slt, %8, %9 : vector<8x1xi32>
    %c0 = arith.constant 0 : index
    %c0_2 = arith.constant 0 : index
    %11 = vector.load %arg2[%c0, %c0_2] : memref<8x32xf32, #tpu.memory_space<vmem>>, vector<8x32xf32>
    %c0_3 = arith.constant 0 : index
    %c0_4 = arith.constant 0 : index
    %12 = vector.load %arg3[%c0_3, %c0_4] : memref<8x32xf32, #tpu.memory_space<vmem>>, vector<8x32xf32>
    %c0_5 = arith.constant 0 : index
    %c0_6 = arith.constant 0 : index
    %13 = vector.load %arg4[%c0_5, %c0_6] : memref<8x32xf32, #tpu.memory_space<vmem>>, vector<8x32xf32>
    %14 = arith.mulf %11, %11 : vector<8x32xf32>
    %cst = arith.constant dense<0.000000e+00> : vector<8xf32>
    %15 = vector.multi_reduction <add>, %14, %cst [1] : vector<8x32xf32> to vector<8xf32>
    %16 = vector.shape_cast %15 : vector<8xf32> to vector<8x1xf32>
    %17 = arith.mulf %12, %12 : vector<8x32xf32>
    %cst_7 = arith.constant dense<0.000000e+00> : vector<8xf32>
    %18 = vector.multi_reduction <add>, %17, %cst_7 [1] : vector<8x32xf32> to vector<8xf32>
    %19 = vector.shape_cast %18 : vector<8xf32> to vector<8x1xf32>
    %20 = arith.mulf %13, %13 : vector<8x32xf32>
    %cst_8 = arith.constant dense<0.000000e+00> : vector<8xf32>
    %21 = vector.multi_reduction <add>, %20, %cst_8 [1] : vector<8x32xf32> to vector<8xf32>
    %22 = vector.shape_cast %21 : vector<8xf32> to vector<8x1xf32>
    %23 = arith.mulf %11, %12 : vector<8x32xf32>
    %cst_9 = arith.constant dense<0.000000e+00> : vector<8xf32>
    %24 = vector.multi_reduction <add>, %23, %cst_9 [1] : vector<8x32xf32> to vector<8xf32>
    %25 = vector.shape_cast %24 : vector<8xf32> to vector<8x1xf32>
    %26 = arith.mulf %11, %13 : vector<8x32xf32>
    %cst_10 = arith.constant dense<0.000000e+00> : vector<8xf32>
    %27 = vector.multi_reduction <add>, %26, %cst_10 [1] : vector<8x32xf32> to vector<8xf32>
    %28 = vector.shape_cast %27 : vector<8xf32> to vector<8x1xf32>
    %29 = arith.mulf %16, %19 : vector<8x1xf32>
    %cst_11 = arith.constant 1.000000e-16 : f32
    %30 = vector.broadcast %cst_11 : f32 to vector<8x1xf32>
    %31 = arith.maximumf %29, %30 : vector<8x1xf32>
    %32 = math.rsqrt %31 : vector<8x1xf32>
    %33 = arith.mulf %25, %32 : vector<8x1xf32>
    %34 = arith.mulf %16, %22 : vector<8x1xf32>
    %cst_12 = arith.constant 1.000000e-16 : f32
    %35 = vector.broadcast %cst_12 : f32 to vector<8x1xf32>
    %36 = arith.maximumf %34, %35 : vector<8x1xf32>
    %37 = math.rsqrt %36 : vector<8x1xf32>
    %38 = arith.mulf %28, %37 : vector<8x1xf32>
    %39 = arith.subf %38, %33 : vector<8x1xf32>
    %cst_13 = arith.constant 1.000000e+00 : f32
    %40 = vector.broadcast %cst_13 : f32 to vector<8x1xf32>
    %41 = arith.addf %39, %40 : vector<8x1xf32>
    %cst_14 = arith.constant 0.000000e+00 : f32
    %42 = vector.broadcast %cst_14 : f32 to vector<8x1xf32>
    %43 = arith.maximumf %41, %42 : vector<8x1xf32>
    %cst_15 = arith.constant 0.000000e+00 : f32
    %44 = vector.broadcast %cst_15 : f32 to vector<8x1xf32>
    %45 = arith.select %10, %43, %44 : vector<8x1xi1>, vector<8x1xf32>
    %c0_16 = arith.constant 0 : index
    %c0_17 = arith.constant 0 : index
    %46 = vector.load %arg9[%c0_16, %c0_17] : memref<1x1xf32, #tpu.memory_space<vmem>>, vector<1x1xf32>
    %cst_18 = arith.constant dense<0.000000e+00> : vector<1xf32>
    %47 = vector.multi_reduction <add>, %45, %cst_18 [0] : vector<8x1xf32> to vector<1xf32>
    %48 = vector.shape_cast %47 : vector<1xf32> to vector<1x1xf32>
    %49 = arith.addf %46, %48 : vector<1x1xf32>
    %c0_19 = arith.constant 0 : index
    %c0_20 = arith.constant 0 : index
    %50 = vector.load %arg9[%c0_19, %c0_20] : memref<1x1xf32, #tpu.memory_space<vmem>>, vector<1x1xf32>
    tpu.vector_store %arg9[%c0_19, %c0_20], %49 {strides = array<i32>} : memref<1x1xf32, #tpu.memory_space<vmem>>, vector<1x1xf32>,
    %c0_21 = arith.constant 0 : index
    %c0_22 = arith.constant 0 : index
    %51 = vector.load %arg5[%c0_21, %c0_22] : memref<8x1xf32, #tpu.memory_space<vmem>>, vector<8x1xf32>
    %c0_23 = arith.constant 0 : index
    %c0_24 = arith.constant 0 : index
    %52 = vector.load %arg6[%c0_23, %c0_24] : memref<8x1xf32, #tpu.memory_space<vmem>>, vector<8x1xf32>
    %cst_25 = arith.constant 0.000000e+00 : f32
    %53 = vector.broadcast %cst_25 : f32 to vector<8x1xf32>
    %54 = arith.maximumf %51, %53 : vector<8x1xf32>
    %55 = arith.mulf %51, %52 : vector<8x1xf32>
    %56 = arith.subf %54, %55 : vector<8x1xf32>
    %57 = math.absf %51 : vector<8x1xf32>
    %cst_26 = arith.constant 0.000000e+00 : f32
    %58 = vector.broadcast %cst_26 : f32 to vector<8x1xf32>
    %59 = arith.subf %58, %57 : vector<8x1xf32>
    %60 = math.exp %59 : vector<8x1xf32>
    %61 = math.log1p %60 : vector<8x1xf32>
    %62 = arith.addf %56, %61 : vector<8x1xf32>
    %cst_27 = arith.constant 0.000000e+00 : f32
    %63 = vector.broadcast %cst_27 : f32 to vector<8x1xf32>
    %64 = arith.select %10, %62, %63 : vector<8x1xi1>, vector<8x1xf32>
    %c0_28 = arith.constant 0 : index
    %c0_29 = arith.constant 0 : index
    %65 = vector.load %arg10[%c0_28, %c0_29] : memref<1x1xf32, #tpu.memory_space<vmem>>, vector<1x1xf32>
    %cst_30 = arith.constant dense<0.000000e+00> : vector<8xf32>
    %66 = vector.multi_reduction <add>, %64, %cst_30 [1] : vector<8x1xf32> to vector<8xf32>
    %67 = vector.shape_cast %66 : vector<8xf32> to vector<8x1xf32>
    %cst_31 = arith.constant dense<0.000000e+00> : vector<1xf32>
    %68 = vector.multi_reduction <add>, %67, %cst_31 [0] : vector<8x1xf32> to vector<1xf32>
    %69 = vector.shape_cast %68 : vector<1xf32> to vector<1x1xf32>
    %70 = arith.addf %65, %69 : vector<1x1xf32>
    %c0_32 = arith.constant 0 : index
    %c0_33 = arith.constant 0 : index
    %71 = vector.load %arg10[%c0_32, %c0_33] : memref<1x1xf32, #tpu.memory_space<vmem>>, vector<1x1xf32>
    tpu.vector_store %arg10[%c0_32, %c0_33], %70 {strides = array<i32>} : memref<1x1xf32, #tpu.memory_space<vmem>>, vector<1x1xf32>,
    %c0_i32_34 = arith.constant 0 : i32
    %72 = arith.cmpi eq, %arg1, %c0_i32_34 : i32
    %73 = arith.extui %72 : i1 to i32
    %c0_i32_35 = arith.constant 0 : i32
    %74 = arith.cmpi ne, %73, %c0_i32_35 : i32
    scf.if %74 {
      %c0_36 = arith.constant 0 : index
      %c0_37 = arith.constant 0 : index
      %75 = vector.load %arg9[%c0_36, %c0_37] : memref<1x1xf32, #tpu.memory_space<vmem>>, vector<1x1xf32>
      %c0_38 = arith.constant 0 : index
      %c0_39 = arith.constant 0 : index
      %76 = vector.load %arg7[%c0_38, %c0_39] : memref<1x1xf32, #tpu.memory_space<vmem>>, vector<1x1xf32>
      tpu.vector_store %arg7[%c0_38, %c0_39], %75 {strides = array<i32>} : memref<1x1xf32, #tpu.memory_space<vmem>>, vector<1x1xf32>,
      %c0_40 = arith.constant 0 : index
      %c0_41 = arith.constant 0 : index
      %77 = vector.load %arg10[%c0_40, %c0_41] : memref<1x1xf32, #tpu.memory_space<vmem>>, vector<1x1xf32>
      %c0_42 = arith.constant 0 : index
      %c0_43 = arith.constant 0 : index
      %78 = vector.load %arg8[%c0_42, %c0_43] : memref<1x1xf32, #tpu.memory_space<vmem>>, vector<1x1xf32>
      tpu.vector_store %arg8[%c0_42, %c0_43], %77 {strides = array<i32>} : memref<1x1xf32, #tpu.memory_space<vmem>>, vector<1x1xf32>,
    } else {
    }
    return
  }
  func.func @transform_0(%arg0: i32, %arg1: i32) -> (i32, i32) {
    %c1_i32 = arith.constant 1 : i32
    %0 = arith.muli %arg0, %c1_i32 : i32
    %1 = arith.addi %0, %arg1 : i32
    %c0_i32 = arith.constant 0 : i32
    %2 = arith.minsi %1, %c0_i32 : i32
    %c0_i32_0 = arith.constant 0 : i32
    %c0_i32_1 = arith.constant 0 : i32
    return %2, %c0_i32_0 : i32, i32
  }
  func.func @transform_1(%arg0: i32, %arg1: i32) -> (i32, i32) {
    %c1_i32 = arith.constant 1 : i32
    %0 = arith.muli %arg0, %c1_i32 : i32
    %1 = arith.addi %0, %arg1 : i32
    %c0_i32 = arith.constant 0 : i32
    %2 = arith.minsi %1, %c0_i32 : i32
    %c0_i32_0 = arith.constant 0 : i32
    %c0_i32_1 = arith.constant 0 : i32
    return %2, %c0_i32_0 : i32, i32
  }
  func.func @transform_2(%arg0: i32, %arg1: i32) -> (i32, i32) {
    %c1_i32 = arith.constant 1 : i32
    %0 = arith.muli %arg0, %c1_i32 : i32
    %1 = arith.addi %0, %arg1 : i32
    %c0_i32 = arith.constant 0 : i32
    %2 = arith.minsi %1, %c0_i32 : i32
    %c0_i32_0 = arith.constant 0 : i32
    %c0_i32_1 = arith.constant 0 : i32
    return %2, %c0_i32_0 : i32, i32
  }
  func.func @transform_3(%arg0: i32, %arg1: i32) -> (i32, i32) {
    %c1_i32 = arith.constant 1 : i32
    %0 = arith.muli %arg0, %c1_i32 : i32
    %1 = arith.addi %0, %arg1 : i32
    %c0_i32 = arith.constant 0 : i32
    %2 = arith.minsi %1, %c0_i32 : i32
    %c0_i32_0 = arith.constant 0 : i32
    %c0_i32_1 = arith.constant 0 : i32
    return %2, %c0_i32_0 : i32, i32
  }
  func.func @transform_4(%arg0: i32, %arg1: i32) -> (i32, i32) {
    %c1_i32 = arith.constant 1 : i32
    %0 = arith.muli %arg0, %c1_i32 : i32
    %1 = arith.addi %0, %arg1 : i32
    %c0_i32 = arith.constant 0 : i32
    %2 = arith.minsi %1, %c0_i32 : i32
    %c0_i32_0 = arith.constant 0 : i32
    %c0_i32_1 = arith.constant 0 : i32
    return %2, %c0_i32_0 : i32, i32
  }
  func.func @transform_5(%arg0: i32, %arg1: i32) -> (i32, i32) {
    %c0_i32 = arith.constant 0 : i32
    %c0_i32_0 = arith.constant 0 : i32
    return %arg0, %c0_i32 : i32, i32
  }
  func.func @transform_6(%arg0: i32, %arg1: i32) -> (i32, i32) {
    %c0_i32 = arith.constant 0 : i32
    %c0_i32_0 = arith.constant 0 : i32
    return %arg0, %c0_i32 : i32, i32
  }
}

</mosaic_0001>

<bundles_post_ra>
// kernel: tpu_custom_call.1
= control target key start
LH: loop header
LB: loop body
LE: loop exit
PB: predicated region body
PF: predicated region fallthrough
CT: control target
= control target key end

     0   :  { %12 = vsyncpa [#allocation5], 0  ;;  %vm177_vm0 = vcmask 261120   ;;  %s463_s0 = inlined_call_operand.vmem [shape: f32[8,32], index: 0, kind: input, shape index: {}]   ;;  %s464_s1 = inlined_call_operand.vmem [shape: f32[8,32], index: 1, kind: input, shape index: {}]   ;;  %s465_s2 = inlined_call_operand.vmem [shape: f32[8,32], index: 2, kind: input, shape index: {}]   ;;  %s466_s3 = inlined_call_operand.vmem [shape: f32[8,1], index: 3, kind: input, shape index: {}]   ;;  %s467_s4 = inlined_call_operand.vmem [shape: f32[8,1], index: 4, kind: input, shape index: {}]   ;;  %s468_s5 = inlined_call_operand.hbm [shape: f32[1,1], index: 5, kind: output, shape index: {0}]   ;;  %s469_s6 = inlined_call_operand.hbm [shape: f32[1,1], index: 6, kind: output, shape index: {1}]  }
   0x1   :  { %v175_v0 = vld [vmem:[%s465_s2] sm:$0xff] }
   0x2   :  { %v173_v1 = vld [vmem:[%s463_s0] sm:$0xff]  ;;  %v185_v3 = vmul.f32 %v175_v0, %v175_v0 }
   0x3   :  { %v174_v2 = vld [vmem:[%s464_s1] sm:$0xff]  ;;  %v176_v4 = vmul.f32 %v173_v1, %v173_v1 }
   0x4   :  { %v181_v5 = vmul.f32 %v174_v2, %v174_v2 }
   0x5   :  { %13 = vsyncpa [#allocation7], 0  ;;  %v189_v6 = vmul.f32 %v174_v2, %v173_v1  ;;  %v186_v7 = vsel %vm177_vm0, %v185_v3, 0.0  ;;  %v178_v8 = vsel %vm177_vm0, %v176_v4, 0.0  ;;  %v193_v10 = vmul.f32 %v175_v0, %v173_v1  ;;  %v219_v12 = vld [vmem:[%s466_s3] sm:$0xff]  ;;  %s376_s3 = smov [#allocation6]  }
   0x6   :  { %187 = vadd.xlane.f32.xlu1 %v186_v7  ;;  %179 = vadd.xlane.f32.xlu0 %v178_v8  ;;  %v182_v9 = vsel %vm177_vm0, %v181_v5, 0.0  ;;  %v224_v14 = vand.u32 2147483647, %v219_v12  ;;  %v220_v20 = vld [vmem:[%s467_s4] sm:$0xff]  ;;  %v221_v23 = vmax.f32 %v219_v12, 0.0  ;;  %vm241_vm2 = vcmask 7168  }
   0x7   :  { %v190_v11 = vsel %vm177_vm0, %v189_v6, 0.0  ;;  %v194_v13 = vsel %vm177_vm0, %v193_v10, 0.0  ;;  %v222_v24 = vmul.f32 %v220_v20, %v219_v12  ;;  %vm163_vm3 = vcmask 0   ;;  %s274_s4 = sshll.u32 %s376_s3, 4  ;;  %s275_s4 = int_to_ptr.vmem [resolvable:$true] %s274_s4 }
   0x8   :  { %v225_v15 = vsub.f32 0.0, %v224_v14  ;;  %v375_v34 = vmov 0.0   ;;  %s327_s28 = scalar_lea.vmem %s275_s4, 16  ;;  %s331_s29 = scalar_lea.vmem %s275_s4, 32 }
   0x9   :  { %v223_v28 = vsub.f32 %v221_v23, %v222_v24  ;;  %164 = vst.msk [vmem:[#allocation2] sm:$0x1] %vm163_vm3, %v375_v34  ;;  %165 = vst.msk [vmem:[#allocation3] sm:$0x1] %vm163_vm3, %v375_v34  ;;  %p328_p0 = scmp.ne.s32.totalorder %s275_s4, %s327_s28  ;;  %p332_p1 = scmp.lt.s32.totalorder %s275_s4, %s275_s4 }
   0xa   :  { %183 = vadd.xlane.f32.xlu0 %v182_v9  ;;  %191 = vadd.xlane.f32.xlu1 %v190_v11  ;;  %v226_v16 = vmul.f32 1.442695, %v225_v15  ;;  %p333_p2 = scmp.lt.s32.totalorder %s331_s29, %s327_s28 }
   0xc   :  { %319 = vpow2.f32 %v226_v16  ;;  %p334_p3 = por %p333_p2, %p332_p1 }
   0xe   :  { %195 = vadd.xlane.f32.xlu0 %v194_v13  ;;  %p335_p4 = pnand %p334_p3, %p328_p0 }
  0x10   :  { %v239_v39 = vld [vmem:[#allocation3] sm:$0x1] }
  0x16   :  { %v320_v17 = vpop.eup %319 }
  0x17   :  { %v228_v18 = vadd.f32 1.0, %v320_v17  ;;  %v231_v19 = vmul.f32 -0.5, %v320_v17  ;;  %v234_v25 = vand.u32 2147483647, %v320_v17 }
  0x19   :  { %321 = vlog2.f32 %v228_v18  ;;  %v232_v21 = vadd.f32 1.0, %v231_v19  ;;  %vm235_vm1 = vcmp.lt.f32.partialorder %v234_v25, 0.0004427343 }
  0x1b   :  { %v233_v27 = vmul.f32 %v320_v17, %v232_v21 }
  0x23   :  { %v322_v22 = vpop.eup %321 }
  0x24   :  { %v230_v26 = vmul.f32 0.6931472, %v322_v22 }
  0x26   :  { %v236_v29 = vsel %vm235_vm1, %v233_v27, %v230_v26 }
  0x27   :  { %v237_v30 = vadd.f32 %v236_v29, %v223_v28 }
  0x29   :  { %v242_v31 = vsel %vm241_vm2, %v237_v30, 0.0 }
  0x2a   :  { %v243_v32 = vrot.slane %v242_v31, 4 }
  0x2c   :  { %v244_v33 = vadd.f32 %v243_v32, %v242_v31 }
  0x2e   :  { %v245_v35 = vrot.slane %v244_v33, 2 }
  0x30   :  { %v246_v36 = vadd.f32 %v245_v35, %v244_v33 }
  0x32   :  { %v247_v37 = vrot.slane %v246_v36, 1 }
  0x34   :  { %v248_v38 = vadd.f32 %v247_v37, %v246_v36 }
  0x36   :  { %v249_v40 = vadd.f32 %v248_v38, %v239_v39 }
  0x38   :  { %250 = vst.msk [vmem:[#allocation3] sm:$0x1] %vm163_vm3, %v249_v40 }
  0x3f   :  { %v256_v41 = vld [vmem:[#allocation3] sm:$0x1] }
  0x40   :  { %257 = vst.msk [vmem:[#allocation6] sm:$0x1] %vm163_vm3, %v256_v41 }
  0x41   :  { %338 = shalt.err (!%p335_p4)
}
  0x42   :  { %s339_s8 = scalar_lea.hbm %s469_s6, 16 }
  0x43   :  { %p340_p5 = scmp.ne.s32.totalorder %s469_s6, %s339_s8  ;;  %p343_p6 = scmp.lt.u32.totalorder %s339_s8, %s469_s6 }
  0x45   :  { %p345_p7 = pnand %p343_p6, %p340_p5 }
  0x47   :  { %348 = shalt.err (!%p345_p7)
}
  0x48   :  { %277 = dma.vmem_to_hbm [thread:$0]  %s275_s4, 16, %s469_s6, [#allocation7]   ;;  %v209_v63 = vld [vmem:[#allocation2] sm:$0x1] }
  0x49   :  { %s377_s6 = smov [#allocation4]  }
  0x4a   :  { %s264_s15 = sshll.u32 %s377_s6, 4  ;;  %s265_s15 = int_to_ptr.vmem [resolvable:$true] %s264_s15 }
  0x4b   :  { %s349_s16 = scalar_lea.vmem %s265_s15, 16  ;;  %s353_s17 = scalar_lea.vmem %s265_s15, 32 }
  0x4c   :  { %p350_p8 = scmp.ne.s32.totalorder %s265_s15, %s349_s16  ;;  %p354_p9 = scmp.lt.s32.totalorder %s265_s15, %s265_s15 }
  0x4d   :  { %p355_p10 = scmp.lt.s32.totalorder %s353_s17, %s349_s16 }
  0x4f   :  { %p356_p11 = por %p355_p10, %p354_p9 }
  0x51   :  { %p357_p12 = pnand %p356_p11, %p350_p8 }
  0x93   :  { %v188_v42 = vpop.xlane.xlu1 %187  ;;  %v180_v43 = vpop.xlane.xlu0 %179 }
  0x94   :  { %v201_v44 = vmul.f32 %v188_v42, %v180_v43 }
  0x96   :  { %v202_v45 = vmax.f32 %v201_v44, 1e-16 }
  0x97   :  { %v184_v46 = vpop.xlane.xlu0 %183  ;;  %v192_v51 = vpop.xlane.xlu1 %191 }
  0x98   :  { %v197_v47 = vmul.f32 %v184_v46, %v180_v43  ;;  %323 = vrsqrt.f32 %v202_v45 }
  0x9a   :  { %v198_v48 = vmax.f32 %v197_v47, 1e-16 }
  0x9b   :  { %v196_v50 = vpop.xlane.xlu0 %195 }
  0x9c   :  { %325 = vrsqrt.f32 %v198_v48 }
  0xa2   :  { %v324_v49 = vpop.eup %323 }
  0xa3   :  { %v204_v53 = vmul.f32 %v324_v49, %v196_v50 }
  0xa6   :  { %v326_v52 = vpop.eup %325 }
  0xa7   :  { %v200_v54 = vmul.f32 %v326_v52, %v192_v51 }
  0xa9   :  { %v205_v55 = vsub.f32 %v204_v53, %v200_v54 }
  0xab   :  { %v206_v56 = vadd.f32 1.0, %v205_v55 }
  0xad   :  { %v207_v57 = vmax.f32 %v206_v56, 0.0 }
  0xaf   :  { %v210_v58 = vrot.slane %v207_v57, 4 }
  0xb1   :  { %v211_v59 = vadd.f32 %v210_v58, %v207_v57 }
  0xb3   :  { %v212_v60 = vrot.slane %v211_v59, 2 }
  0xb5   :  { %v213_v61 = vadd.f32 %v212_v60, %v211_v59 }
  0xb7   :  { %v214_v62 = vrot.slane %v213_v61, 1 }
  0xb9   :  { %v215_v0 = vadd.f32 %v214_v62, %v213_v61 }
  0xbb   :  { %v216_v1 = vadd.f32 %v215_v0, %v209_v63 }
  0xbd   :  { %218 = vst.msk [vmem:[#allocation2] sm:$0x1] %vm163_vm3, %v216_v1 }
  0xc4   :  { %v254_v2 = vld [vmem:[#allocation2] sm:$0x1] }
  0xc5   :  { %255 = vst.msk [vmem:[#allocation4] sm:$0x1] %vm163_vm3, %v254_v2 }
  0xc6   :  { %360 = shalt.err (!%p357_p12)
}
  0xc7   :  { %s361_s20 = scalar_lea.hbm %s468_s5, 16 }
  0xc8   :  { %p362_p13 = scmp.ne.s32.totalorder %s468_s5, %s361_s20  ;;  %p365_p0 = scmp.lt.u32.totalorder %s361_s20, %s468_s5 }
  0xca   :  { %p367_p1 = pnand %p365_p0, %p362_p13 }
  0xcc   :  { %370 = shalt.err (!%p367_p1)
}
  0xcd   :  { %267 = dma.vmem_to_hbm [thread:$0]  %s265_s15, 16, %s468_s5, [#allocation5]  }
  0xce   :  { %371 = dma.done.wait [#allocation5], 16  }
  0xcf   :  { %372 = vsyncadd [#allocation5], 4294967280 }
  0xd0   :  { %373 = dma.done.wait [#allocation7], 16  }
  0xd1   :  { %374 = vsyncadd [#allocation7], 4294967280 }
  0xd2   :  { %284 = vsyncpa [#allocation5], 1 }
  0xd3   :  { %285 = vsyncpa [#allocation7], 1 }

</bundles_post_ra>
